<compile_context>
chip_gen: v7x
topology: tpu7x:2x2x1
jax: 0.10.0
libtpu: 0.0.40
codegen_flags: <defaults>
</compile_context>

<pallas_src>
import jax
import jax.numpy as jnp
import numpy as np
from jax.experimental import pallas as pl
from jax.experimental.pallas import tpu as pltpu


# ----------------------------------------------------------------------------
# Pallas kernel (transposed layout: features on sublanes, batch on lanes).
# ----------------------------------------------------------------------------
def _dfnn_kernel(xT_ref, w1r_ref, b1T_ref, wfused_ref, bhT_ref, wselT_ref,
                 o_ref):
    D = w1r_ref.shape[0]          # space_dim + 1
    H = w1r_ref.shape[1]          # hidden features
    TN = xT_ref.shape[1]          # lane tile
    L = wfused_ref.shape[0]       # hidden layers
    DH = D * H

    XT = xT_ref[...]              # (D, TN)
    W1r = w1r_ref[...]            # (D, H, 1),  W1r[k, j, 0] = W1[k, j]

    # ---- first layer --------------------------------------------------------
    # Primal via D tiny VPU broadcast-FMAs.  (Review opt 8's K=D MXU dot is
    # consciously traded away: this layer seeds every tangent and the rho*10
    # row, the exact-f32 VPU path keeps the 2e-3 parity gate safe, and the MXU
    # is idle here anyway.)
    ZT = b1T_ref[...]                                     # (H, 1) -> broadcasts
    for k in range(D):
        ZT = ZT + W1r[k] * XT[k:k + 1, :]                 # (H,1)*(1,TN) -> (H,TN)
    HT = jnp.tanh(ZT)                                     # (H, TN)
    dact = 1.0 - HT * HT
    # Tangent seed T_k[j] = tanh'(z_j) * W1[k, j]: leading-dim + lane broadcast,
    # no jnp.tile materialization.
    T3 = W1r * dact[None]                                 # (D, H, TN)
    S = jnp.concatenate([HT, T3.reshape(DH, TN)], axis=0)  # ((D+1)*H, TN)

    # ---- hidden layers: ONE fused 128x128 block-diag MXU dot per layer ------
    # wfused[l] = kron(I_{D+1}, Wh[l].T) acts on the stacked [h; T_1..T_D] slab:
    # primal and all D tangents propagate in a single MXU push.
    for l in range(L):
        Z = jnp.dot(wfused_ref[l], S, preferred_element_type=jnp.float32)
        HT = jnp.tanh(Z[:H] + bhT_ref[l])                 # (H, TN)
        dact = 1.0 - HT * HT
        T3 = Z[H:].reshape(D, H, TN) * dact[None]         # free sublane-split view
        S = jnp.concatenate([HT, T3.reshape(DH, TN)], axis=0)

    # ---- fused output projection --------------------------------------------
    # Mixture mean + antisymmetrization + rho*10 folded into wselT; primal
    # columns and pad rows are zero -> one (8,128)x(128,TN) dot, lane-dense store.
    o_ref[...] = jnp.dot(wselT_ref[...], S, preferred_element_type=jnp.float32)


# ----------------------------------------------------------------------------
# Wrappers.
# ----------------------------------------------------------------------------
def divfree_forward_T(xT, packed_params, *, tile_n=None):
    """Performance API: xT is (D, N) (features, batch); returns (D, N).
    No batch-sized transpose outside the kernel on this path."""
    W1r, b1T, Wfused, bhT, WselT_pad = packed_params
    D, N = xT.shape
    H = b1T.shape[0]
    L = Wfused.shape[0]
    M = Wfused.shape[1]                 # (D + 1) * H
    D_pad = WselT_pad.shape[0]

    if tile_n is None:
        # Large lane tiles amortize the ~0.35us/step overhead; keep >= 2 grid
        # steps (when N > 128) so the "parallel" axis shards across both v7x
        # TensorCores.  Cap 4096 keeps the per-tile VMEM working set ~10 MB.
        half = (N + 1) // 2
        tile_n = ((half + 127) // 128) * 128
        tile_n = max(128, min(4096, tile_n))

    n_pad = (-N) % tile_n
    N_pad = N + n_pad
    xT_p = jnp.pad(xT, ((0, 0), (0, n_pad))) if n_pad else xT
    grid = (N_pad // tile_n,)

    weight_bytes = sum(int(a.size) * a.dtype.itemsize for a in packed_params)
    cost = pl.CostEstimate(
        flops=int(N_pad) * (3 * D * H + 2 * L * M * M + 2 * D_pad * M),
        transcendentals=int(N_pad) * (L + 1) * H,
        bytes_accessed=4 * int(N_pad) * (D + D_pad) + weight_bytes,
    )

    outT = pl.pallas_call(
        _dfnn_kernel,
        out_shape=jax.ShapeDtypeStruct((D_pad, N_pad), jnp.float32),
        grid=grid,
        in_specs=[
            pl.BlockSpec((D, tile_n), lambda i: (0, i)),
            # Constant-index weight blocks: the block index never changes, so
            # the pipeline keeps the resident copy and never re-fetches it.
            pl.BlockSpec((D, H, 1), lambda i: (0, 0, 0)),
            pl.BlockSpec((H, 1), lambda i: (0, 0)),
            pl.BlockSpec((L, M, M), lambda i: (0, 0, 0)),
            pl.BlockSpec((L, H, 1), lambda i: (0, 0, 0)),
            pl.BlockSpec((D_pad, M), lambda i: (0, 0)),
        ],
        out_specs=pl.BlockSpec((D_pad, tile_n), lambda i: (0, i)),
        compiler_params=pltpu.CompilerParams(
            dimension_semantics=("parallel",),
            vmem_limit_bytes=48 * 1024 * 1024),
        cost_estimate=cost,
    )(xT_p, W1r, b1T, Wfused, bhT, WselT_pad)
    return outT[:D, :N]


def divfree_forward(x, packed_params, *, tile_n=None):
    """(N, D)-layout convenience wrapper matching the PyTorch module's forward.
    The two .T here are the only batch-sized transposes; under jit they fuse
    with neighbouring producers/consumers.  Use divfree_forward_T directly in
    performance-critical pipelines."""
    return divfree_forward_T(x.T, packed_params, tile_n=tile_n).T


# ----------------------------------------------------------------------------
# Deterministic parameter init (PyTorch-Linear-style uniform bounds) + packing.
# ----------------------------------------------------------------------------
def init_params(key, space_dim, hidden_features, num_layers, n_mixtures):
    D = space_dim + 1
    H = hidden_features
    L = num_layers
    M = (D + 1) * H

    def linear(k, fi, fo):
        kw, kb = jax.random.split(k)
        bound = 1.0 / np.sqrt(fi)
        W = jax.random.uniform(kw, (fi, fo), jnp.float32, -bound, bound)
        b = jax.random.uniform(kb, (1, fo), jnp.float32, -bound, bound)
        return W, b

    keys = jax.random.split(key, L + 2)
    W1, b1 = linear(keys[0], D, H)
    Wh_list, bh_list = [], []
    for l in range(L):
        W, b = linear(keys[1 + l], H, H)
        Wh_list.append(W)
        bh_list.append(b)
    Wh = jnp.stack(Wh_list, 0)                      # (L, H, H)
    bh = jnp.stack(bh_list, 0)                      # (L, 1, H)
    Wout, bout = linear(keys[-1], H, n_mixtures * D * D)

    # Fold mixture mean + antisymmetrization into a per-tangent selector:
    #   u_i = sum_{k,h} (Weff[h,i,k] - Weff[h,k,i]) * T_k[h]
    Weff = Wout.reshape(H, n_mixtures, D, D).mean(axis=1)                    # (H, D, D)
    Wsel = jnp.transpose(Weff, (2, 0, 1)) - jnp.transpose(Weff, (1, 0, 2))   # (D, H, D); [k,h,i]

    # ---- transposed / fused packing for the kernel --------------------------
    W1r = W1.reshape(D, H, 1)                       # [k, j, 0] = W1[k, j]
    b1T = b1.reshape(H, 1)
    WhT = jnp.transpose(Wh, (0, 2, 1))              # (L, H, H) = Wh[l].T
    bhT = jnp.transpose(bh, (0, 2, 1))              # (L, H, 1)
    # One fused per-layer weight acting on the stacked [h; T_1..T_D] slab:
    # kron(I_{D+1}, Wh[l].T)  ->  (D+1)*H square (128x128 for H=32, D=3).
    eye = jnp.eye(D + 1, dtype=jnp.float32)
    Wfused = jnp.einsum('ab,lij->laibj', eye, WhT).reshape(L, M, M)

    # Fused output projection: rho*10 folded into row 0, primal columns zeroed,
    # rows padded to 8 sublanes for a lane-dense unmasked output store.
    scale = jnp.where(jnp.arange(D) == 0, 10.0, 1.0).astype(jnp.float32)
    Wsel_s = Wsel * scale[None, None, :]
    WselT_core = jnp.transpose(Wsel_s, (2, 0, 1)).reshape(D, D * H)          # [i, k*H+h]
    D_pad = ((D + 7) // 8) * 8
    WselT_pad = jnp.zeros((D_pad, M), jnp.float32).at[:D, H:].set(WselT_core)

    packed = (W1r, b1T, Wfused, bhT, WselT_pad)
    raw = (W1, b1, Wh, bh, Wout, bout)
    return packed, raw


# ----------------------------------------------------------------------------
# Pure-JAX reference (jacfwd of the antisymmetric matrix field) for validation.
# ----------------------------------------------------------------------------
def ref_forward(x, raw_params, n_mixtures):
    W1, b1, Wh, bh, Wout, bout = raw_params
    D = x.shape[-1]

    def B_fn(xi):
        h = jnp.tanh(xi @ W1 + b1[0])
        for l in range(Wh.shape[0]):
            h = jnp.tanh(h @ Wh[l] + bh[l, 0])
        out = h @ Wout + bout[0]
        return out.reshape(n_mixtures, D, D).mean(0)

    def A_fn(xi):
        B = B_fn(xi)
        return B - B.T

    def u_fn(xi):
        J = jax.jacfwd(A_fn)(xi)               # J[i, j, k] = dA_ij / dx_k
        return jnp.einsum("ijj->i", J)         # u_i = sum_j dA_ij/dx_j

    u = jax.vmap(u_fn)(x)
    return jnp.concatenate([u[:, :1] * 10.0, u[:, 1:]], axis=-1)


if __name__ == "__main__":
    space_dim = 2          # -> in_features = out_features = 3  ([t, x1, x2])
    hidden_features = 32   # (D+1)*H = 128 -> one MXU tile per fused layer dot
    num_layers = 2
    n_mixtures = 8
    D = space_dim + 1
    N = 256                # default tile_n = 128, grid = 2 (both v7x TCs used)

    key = jax.random.PRNGKey(0)
    kx, kp = jax.random.split(key)
    x = jax.random.normal(kx, (N, D), jnp.float32)

    packed, raw = init_params(kp, space_dim, hidden_features, num_layers,
                              n_mixtures)

    fwd = jax.jit(divfree_forward)
    out = jax.block_until_ready(fwd(x, packed))

    ref = ref_forward(x, raw, n_mixtures)
    err = float(jnp.max(jnp.abs(out - ref)))

    assert out.shape == (N, D), out.shape
    assert err < 2e-3, f"max abs error vs pure-JAX reference: {err}"
    print("KERNEL_OK")
</pallas_src>

<mosaic_0001>
module attributes {stable_mosaic.version = 11 : i64} {
  func.func @_dfnn_kernel(%arg0: i32, %arg1: memref<3x128xf32, #tpu.memory_space<vmem>>, %arg2: memref<3x32x1xf32, #tpu.memory_space<vmem>>, %arg3: memref<32x1xf32, #tpu.memory_space<vmem>>, %arg4: memref<2x128x128xf32, #tpu.memory_space<vmem>>, %arg5: memref<2x32x1xf32, #tpu.memory_space<vmem>>, %arg6: memref<8x128xf32, #tpu.memory_space<vmem>>, %arg7: memref<8x128xf32, #tpu.memory_space<vmem>>) attributes {dimension_semantics = [#tpu.dimension_semantics<parallel>], iteration_bounds = array<i64: 2>, scalar_prefetch = 0 : i64, scratch_operands = 0 : i64, tpu.core_type = #tpu.core_type<tc>, window_params = [{transform_indices = @transform_0, window_bounds = array<i64: 3, 128>}, {pipeline_mode = #tpu.pipeline_mode<synchronous>, transform_indices = @transform_1, window_bounds = array<i64: 3, 32, 1>}, {pipeline_mode = #tpu.pipeline_mode<synchronous>, transform_indices = @transform_2, window_bounds = array<i64: 32, 1>}, {pipeline_mode = #tpu.pipeline_mode<synchronous>, transform_indices = @transform_3, window_bounds = array<i64: 2, 128, 128>}, {pipeline_mode = #tpu.pipeline_mode<synchronous>, transform_indices = @transform_4, window_bounds = array<i64: 2, 32, 1>}, {pipeline_mode = #tpu.pipeline_mode<synchronous>, transform_indices = @transform_5, window_bounds = array<i64: 8, 128>}, {transform_indices = @transform_6, window_bounds = array<i64: 8, 128>}]} {
    %c0 = arith.constant 0 : index
    %c0_0 = arith.constant 0 : index
    %0 = vector.load %arg1[%c0, %c0_0] : memref<3x128xf32, #tpu.memory_space<vmem>>, vector<3x128xf32>
    %c0_1 = arith.constant 0 : index
    %c0_2 = arith.constant 0 : index
    %c0_3 = arith.constant 0 : index
    %1 = vector.load %arg2[%c0_1, %c0_2, %c0_3] : memref<3x32x1xf32, #tpu.memory_space<vmem>>, vector<3x32x1xf32>
    %c0_4 = arith.constant 0 : index
    %c0_5 = arith.constant 0 : index
    %2 = vector.load %arg3[%c0_4, %c0_5] : memref<32x1xf32, #tpu.memory_space<vmem>>, vector<32x1xf32>
    %3 = vector.extract_strided_slice %1 {offsets = [0, 0, 0], sizes = [1, 32, 1], strides = [1, 1, 1]} : vector<3x32x1xf32> to vector<1x32x1xf32>
    %4 = vector.shape_cast %3 : vector<1x32x1xf32> to vector<32x1xf32>
    %5 = vector.extract_strided_slice %0 {offsets = [0, 0], sizes = [1, 128], strides = [1, 1]} : vector<3x128xf32> to vector<1x128xf32>
    %6 = vector.broadcast %4 : vector<32x1xf32> to vector<32x128xf32>
    %7 = vector.broadcast %5 : vector<1x128xf32> to vector<32x128xf32>
    %8 = arith.mulf %6, %7 : vector<32x128xf32>
    %9 = vector.broadcast %2 : vector<32x1xf32> to vector<32x128xf32>
    %10 = arith.addf %9, %8 : vector<32x128xf32>
    %11 = vector.extract_strided_slice %1 {offsets = [1, 0, 0], sizes = [1, 32, 1], strides = [1, 1, 1]} : vector<3x32x1xf32> to vector<1x32x1xf32>
    %12 = vector.shape_cast %11 : vector<1x32x1xf32> to vector<32x1xf32>
    %13 = vector.extract_strided_slice %0 {offsets = [1, 0], sizes = [1, 128], strides = [1, 1]} : vector<3x128xf32> to vector<1x128xf32>
    %14 = vector.broadcast %12 : vector<32x1xf32> to vector<32x128xf32>
    %15 = vector.broadcast %13 : vector<1x128xf32> to vector<32x128xf32>
    %16 = arith.mulf %14, %15 : vector<32x128xf32>
    %17 = arith.addf %10, %16 : vector<32x128xf32>
    %18 = vector.extract_strided_slice %1 {offsets = [2, 0, 0], sizes = [1, 32, 1], strides = [1, 1, 1]} : vector<3x32x1xf32> to vector<1x32x1xf32>
    %19 = vector.shape_cast %18 : vector<1x32x1xf32> to vector<32x1xf32>
    %20 = vector.extract_strided_slice %0 {offsets = [2, 0], sizes = [1, 128], strides = [1, 1]} : vector<3x128xf32> to vector<1x128xf32>
    %21 = vector.broadcast %19 : vector<32x1xf32> to vector<32x128xf32>
    %22 = vector.broadcast %20 : vector<1x128xf32> to vector<32x128xf32>
    %23 = arith.mulf %21, %22 : vector<32x128xf32>
    %24 = arith.addf %17, %23 : vector<32x128xf32>
    %25 = math.tanh %24 : vector<32x128xf32>
    %26 = arith.mulf %25, %25 : vector<32x128xf32>
    %cst = arith.constant 1.000000e+00 : f32
    %27 = vector.broadcast %cst : f32 to vector<32x128xf32>
    %28 = arith.subf %27, %26 : vector<32x128xf32>
    %29 = vector.shape_cast %28 : vector<32x128xf32> to vector<1x32x128xf32>
    %30 = vector.broadcast %1 : vector<3x32x1xf32> to vector<3x32x128xf32>
    %31 = vector.broadcast %29 : vector<1x32x128xf32> to vector<3x32x128xf32>
    %32 = arith.mulf %30, %31 : vector<3x32x128xf32>
    %33 = vector.shape_cast %32 : vector<3x32x128xf32> to vector<96x128xf32>
    %34 = tpu.concatenate %25, %33 in 0 : vector<32x128xf32>, vector<96x128xf32> -> vector<128x128xf32>
    %c0_6 = arith.constant 0 : index
    %c0_7 = arith.constant 0 : index
    %c0_8 = arith.constant 0 : index
    %35 = vector.load %arg4[%c0_6, %c0_7, %c0_8] : memref<2x128x128xf32, #tpu.memory_space<vmem>>, vector<1x128x128xf32>
    %36 = vector.shape_cast %35 : vector<1x128x128xf32> to vector<128x128xf32>
    %cst_9 = arith.constant dense<0.000000e+00> : vector<128x128xf32>
    %37 = tpu.matmul %36, %34, %cst_9 {dimension_numbers = #tpu.dot_dimension_numbers<[1], [0], [0], [1], [0, 0, 1, 1], [], []>} : vector<128x128xf32>, vector<128x128xf32>, vector<128x128xf32> -> vector<128x128xf32>
    %38 = vector.extract_strided_slice %37 {offsets = [0, 0], sizes = [32, 128], strides = [1, 1]} : vector<128x128xf32> to vector<32x128xf32>
    %c0_10 = arith.constant 0 : index
    %c0_11 = arith.constant 0 : index
    %c0_12 = arith.constant 0 : index
    %39 = vector.load %arg5[%c0_10, %c0_11, %c0_12] : memref<2x32x1xf32, #tpu.memory_space<vmem>>, vector<1x32x1xf32>
    %40 = vector.shape_cast %39 : vector<1x32x1xf32> to vector<32x1xf32>
    %41 = vector.broadcast %40 : vector<32x1xf32> to vector<32x128xf32>
    %42 = arith.addf %38, %41 : vector<32x128xf32>
    %43 = math.tanh %42 : vector<32x128xf32>
    %44 = arith.mulf %43, %43 : vector<32x128xf32>
    %cst_13 = arith.constant 1.000000e+00 : f32
    %45 = vector.broadcast %cst_13 : f32 to vector<32x128xf32>
    %46 = arith.subf %45, %44 : vector<32x128xf32>
    %47 = vector.extract_strided_slice %37 {offsets = [32, 0], sizes = [96, 128], strides = [1, 1]} : vector<128x128xf32> to vector<96x128xf32>
    %48 = vector.shape_cast %47 : vector<96x128xf32> to vector<3x32x128xf32>
    %49 = vector.shape_cast %46 : vector<32x128xf32> to vector<1x32x128xf32>
    %50 = vector.broadcast %49 : vector<1x32x128xf32> to vector<3x32x128xf32>
    %51 = arith.mulf %48, %50 : vector<3x32x128xf32>
    %52 = vector.shape_cast %51 : vector<3x32x128xf32> to vector<96x128xf32>
    %53 = tpu.concatenate %43, %52 in 0 : vector<32x128xf32>, vector<96x128xf32> -> vector<128x128xf32>
    %c1 = arith.constant 1 : index
    %c0_14 = arith.constant 0 : index
    %c0_15 = arith.constant 0 : index
    %54 = vector.load %arg4[%c1, %c0_14, %c0_15] : memref<2x128x128xf32, #tpu.memory_space<vmem>>, vector<1x128x128xf32>
    %55 = vector.shape_cast %54 : vector<1x128x128xf32> to vector<128x128xf32>
    %cst_16 = arith.constant dense<0.000000e+00> : vector<128x128xf32>
    %56 = tpu.matmul %55, %53, %cst_16 {dimension_numbers = #tpu.dot_dimension_numbers<[1], [0], [0], [1], [0, 0, 1, 1], [], []>} : vector<128x128xf32>, vector<128x128xf32>, vector<128x128xf32> -> vector<128x128xf32>
    %57 = vector.extract_strided_slice %56 {offsets = [0, 0], sizes = [32, 128], strides = [1, 1]} : vector<128x128xf32> to vector<32x128xf32>
    %c1_17 = arith.constant 1 : index
    %c0_18 = arith.constant 0 : index
    %c0_19 = arith.constant 0 : index
    %58 = vector.load %arg5[%c1_17, %c0_18, %c0_19] : memref<2x32x1xf32, #tpu.memory_space<vmem>>, vector<1x32x1xf32>
    %59 = vector.shape_cast %58 : vector<1x32x1xf32> to vector<32x1xf32>
    %60 = vector.broadcast %59 : vector<32x1xf32> to vector<32x128xf32>
    %61 = arith.addf %57, %60 : vector<32x128xf32>
    %62 = math.tanh %61 : vector<32x128xf32>
    %63 = arith.mulf %62, %62 : vector<32x128xf32>
    %cst_20 = arith.constant 1.000000e+00 : f32
    %64 = vector.broadcast %cst_20 : f32 to vector<32x128xf32>
    %65 = arith.subf %64, %63 : vector<32x128xf32>
    %66 = vector.extract_strided_slice %56 {offsets = [32, 0], sizes = [96, 128], strides = [1, 1]} : vector<128x128xf32> to vector<96x128xf32>
    %67 = vector.shape_cast %66 : vector<96x128xf32> to vector<3x32x128xf32>
    %68 = vector.shape_cast %65 : vector<32x128xf32> to vector<1x32x128xf32>
    %69 = vector.broadcast %68 : vector<1x32x128xf32> to vector<3x32x128xf32>
    %70 = arith.mulf %67, %69 : vector<3x32x128xf32>
    %71 = vector.shape_cast %70 : vector<3x32x128xf32> to vector<96x128xf32>
    %72 = tpu.concatenate %62, %71 in 0 : vector<32x128xf32>, vector<96x128xf32> -> vector<128x128xf32>
    %c0_21 = arith.constant 0 : index
    %c0_22 = arith.constant 0 : index
    %73 = vector.load %arg6[%c0_21, %c0_22] : memref<8x128xf32, #tpu.memory_space<vmem>>, vector<8x128xf32>
    %cst_23 = arith.constant dense<0.000000e+00> : vector<8x128xf32>
    %74 = tpu.matmul %73, %72, %cst_23 {dimension_numbers = #tpu.dot_dimension_numbers<[1], [0], [0], [1], [0, 0, 1, 1], [], []>} : vector<8x128xf32>, vector<128x128xf32>, vector<8x128xf32> -> vector<8x128xf32>
    %c0_24 = arith.constant 0 : index
    %c0_25 = arith.constant 0 : index
    %75 = vector.load %arg7[%c0_24, %c0_25] : memref<8x128xf32, #tpu.memory_space<vmem>>, vector<8x128xf32>
    tpu.vector_store %arg7[%c0_24, %c0_25], %74 {strides = array<i32>} : memref<8x128xf32, #tpu.memory_space<vmem>>, vector<8x128xf32>,
    return
  }
  func.func @transform_0(%arg0: i32) -> (i32, i32) {
    %c0_i32 = arith.constant 0 : i32
    %c0_i32_0 = arith.constant 0 : i32
    return %c0_i32, %arg0 : i32, i32
  }
  func.func @transform_1(%arg0: i32) -> (i32, i32, i32) {
    %c0_i32 = arith.constant 0 : i32
    %c0_i32_0 = arith.constant 0 : i32
    %c0_i32_1 = arith.constant 0 : i32
    %c0_i32_2 = arith.constant 0 : i32
    return %c0_i32, %c0_i32_0, %c0_i32_1 : i32, i32, i32
  }
  func.func @transform_2(%arg0: i32) -> (i32, i32) {
    %c0_i32 = arith.constant 0 : i32
    %c0_i32_0 = arith.constant 0 : i32
    %c0_i32_1 = arith.constant 0 : i32
    return %c0_i32, %c0_i32_0 : i32, i32
  }
  func.func @transform_3(%arg0: i32) -> (i32, i32, i32) {
    %c0_i32 = arith.constant 0 : i32
    %c0_i32_0 = arith.constant 0 : i32
    %c0_i32_1 = arith.constant 0 : i32
    %c0_i32_2 = arith.constant 0 : i32
    return %c0_i32, %c0_i32_0, %c0_i32_1 : i32, i32, i32
  }
  func.func @transform_4(%arg0: i32) -> (i32, i32, i32) {
    %c0_i32 = arith.constant 0 : i32
    %c0_i32_0 = arith.constant 0 : i32
    %c0_i32_1 = arith.constant 0 : i32
    %c0_i32_2 = arith.constant 0 : i32
    return %c0_i32, %c0_i32_0, %c0_i32_1 : i32, i32, i32
  }
  func.func @transform_5(%arg0: i32) -> (i32, i32) {
    %c0_i32 = arith.constant 0 : i32
    %c0_i32_0 = arith.constant 0 : i32
    %c0_i32_1 = arith.constant 0 : i32
    return %c0_i32, %c0_i32_0 : i32, i32
  }
  func.func @transform_6(%arg0: i32) -> (i32, i32) {
    %c0_i32 = arith.constant 0 : i32
    %c0_i32_0 = arith.constant 0 : i32
    return %c0_i32, %arg0 : i32, i32
  }
}

</mosaic_0001>

<bundles_post_ra>
// kernel: divfree_forward.1
= control target key start
LH: loop header
LB: loop body
LE: loop exit
PB: predicated region body
PF: predicated region fallthrough
CT: control target
= control target key end

     0   :  { %11 = vsyncpa [#allocation3], 0  ;;  %s1448_s21 = smov 0   ;;  %s1607_s0 = inlined_call_operand.vmem [shape: f32[3,256], index: 0, kind: input, shape index: {}]   ;;  %s1608_s1 = inlined_call_operand.vmem [shape: f32[3,32,1], index: 1, kind: input, shape index: {}]   ;;  %s1609_s2 = inlined_call_operand.vmem [shape: f32[32,1], index: 2, kind: input, shape index: {}]   ;;  %s1610_s3 = inlined_call_operand.hbm [shape: f32[2,128,128], index: 3, kind: input, shape index: {}]   ;;  %s1611_s4 = inlined_call_operand.vmem [shape: f32[2,32,1], index: 4, kind: input, shape index: {}]   ;;  %s1612_s5 = inlined_call_operand.vmem [shape: f32[8,128], index: 5, kind: input, shape index: {}]   ;;  %s1613_s6 = inlined_call_operand.vmem [shape: f32[8,256], index: 6, kind: output, shape index: {}]  }
   0x1 LB: > { %s1454_s22 = sadd.s32 4294967295, %s1404_s21   ;;  %p986_p0 = scmp.ge.s32.totalorder %s1404_s21, 1  ;;  %s1404_s21 = sphi %s1448_s21, %s17_s21  }
   0x2   : > { %p179_p1 = scmp.lt.s32.totalorder %s1404_s21, 3  ;;  %s1406_s23 = smov [#allocation2]  }
   0x3   : > { %s197_s24 = sshll.u32 %s1406_s23, 4  ;;  %p1614_p3 = scmp.eq.s32.totalorder %s1454_s22, 0  ;;  %s198_s24 = int_to_ptr.vmem [resolvable:$true] %s197_s24 }
   0x4   : > { %p1458_p2 = pnand %p986_p0, %p179_p1  ;;  %s1366_s29 = scalar_lea.hbm %s1610_s3, 4096 }
   0x5   : > { %p1367_p6 = scmp.ne.s32.totalorder %s1610_s3, %s1366_s29  ;;  %p1373_p10 = scmp.lt.u32.totalorder %s1366_s29, %s1610_s3 }
   0x6   : > { %s1616_s25 = scalar_select %p1458_p2, 1, 0 }
   0x7   : > { %p1319_p4 = pneg %p1458_p2 }
   0x9   : > { %p1467_p5 = pnand %p1614_p3, %p1319_p4 }
   0xb   : > { %p1368_p7 = pneg %p1467_p5 }
   0xd   : > { %p1369_p8 = pnand %p1368_p7, %p1367_p6 }
   0xf   : > { %p1370_p9 = pneg %p1369_p8 }
  0x11   : > { %p1375_p11 = pnand %p1373_p10, %p1370_p9 }
  0x13   : > { %1378 = shalt.err (!%p1375_p11)
}
  0x14   : > { %s1379_s10 = scalar_lea.vmem %s198_s24, 4096  ;;  %p1387_p1 = scmp.lt.s32.totalorder %s198_s24, %s198_s24 }
  0x15   : > { %p1380_p12 = scmp.ne.s32.totalorder %s198_s24, %s1379_s10  ;;  %p1388_p4 = scmp.lt.s32.totalorder %s1379_s10, %s1379_s10 }
  0x17   : > { %p1382_p13 = pnand %p1380_p12, %p1368_p7  ;;  %p1389_p3 = por %p1388_p4, %p1387_p1 }
  0x19   : > { %p1383_p0 = pneg %p1382_p13 }
  0x1b   : > { %p1390_p2 = pnand %p1389_p3, %p1383_p0 }
  0x1d   : > { %1393 = shalt.err (!%p1390_p2)
}
  0x1e   : > { %s1407_s11 = smov 128   ;;  %s1408_s12 = smov 8  }
  0x1f   : > { %1322 = dma.hbm_to_vmem [thread:$0]  (!%p1467_p5), %s1610_s3, 4096, %s198_s24, [#allocation3], %s1407_s11, %s1407_s11, %s1408_s12  }
  0x20   : > { %p1618_p6 = scmp.ne.s32.totalorder %s1616_s25, 0 }
  0x21   : > { %p1619_p8 = scmp.eq.s32.totalorder (!%p1618_p6), %s1454_s22, 0 }
  0x22   : > { %226 = sbr.rel (%p1618_p6) target bundleno = 978 (0x3d2), region = 44 }
  0x29   : > { %1399 = dma.done.wait (%p1619_p8), [#allocation3], 4096   ;;  %p1620_p7 = pmov %p1619_p8 }
  0x2a   : > { %v1409_v0 = vmov 0   ;;  %v275_v1 = vld [vmem:[%s1609_s2] sm:$0xff]  ;;  %v276_v3 = vld [vmem:[%s1609_s2 + $0x8] sm:$0xff]  ;;  %v266_v7 = vld [vmem:[%s1608_s1 + $0x18] sm:$0xff]  ;;  %p254_p2 = scmp.lt.s32.totalorder %s1454_s22, 1  ;;  %v299_v26 = vlaneseq  ;;  %vm1411_vm0 = vmmov 0  }
  0x2b   : > { %1401 = vsyncadd (%p1620_p7), [#allocation3], 4294963200  ;;  %1341 = vset.pattern.permute.xlu1 %v1409_v0  ;;  %1340 = vset.pattern.permute.xlu0 %v1409_v0  ;;  %v263_v2 = vld [vmem:[%s1608_s1] sm:$0xff]  ;;  %v264_v4 = vld [vmem:[%s1608_s1 + $0x8] sm:$0xff] }
  0x2c   : > { %309 = vperm.xlu1 %1341, %v275_v1   ;;  %281 = vperm.xlu0 %1340, %v263_v2   ;;  %v268_v5 = vld [vmem:[%s1608_s1 + $0x28] sm:$0xff]  ;;  %v267_v6 = vld [vmem:[%s1608_s1 + $0x20] sm:$0xff]  ;;  %v265_v8 = vld [vmem:[%s1608_s1 + $0x10] sm:$0xff]  ;;  %s1622_s22 = smov (!%p254_p2, %s1454_s22), 1  ;;  %v300_v27 = vshrl.u32 %v299_v26, 7 }
  0x2d   : > { %v272_v9 = vld [vmem:[%s1608_s1 + $0x48] sm:$0xff]  ;;  %v271_v10 = vld [vmem:[%s1608_s1 + $0x40] sm:$0xff]  ;;  %v278_v11 = vld [vmem:[%s1609_s2 + $0x18] sm:$0xff]  ;;  %s991_s19 = sshll.u32 %s1622_s22, 2  ;;  %s992_s27 = sshll.u32 %s1622_s22, 3 }
  0x2e   : > { %v277_v12 = vld [vmem:[%s1609_s2 + $0x10] sm:$0xff]  ;;  %v270_v13 = vld [vmem:[%s1608_s1 + $0x38] sm:$0xff]  ;;  %v581_v17 = vld [vmem:[%s1611_s4 + $0x8] sm:$0xff]  ;;  %s257_s24 = scalar_lea.vmem %s1607_s0, %s991_s19  ;;  %v301_v30 = vsub.s32 0, %v300_v27  ;;  %v353_v34 = vsub.s32 1, %v300_v27  ;;  %v385_v39 = vsub.s32 2, %v300_v27  ;;  %s261_s30 = scalar_lea.vmem %s1613_s6, %s992_s27 }
  0x2f   : > { %v269_v14 = vld [vmem:[%s1608_s1 + $0x30] sm:$0xff]  ;;  %v274_v15 = vld [vmem:[%s1608_s1 + $0x58] sm:$0xff]  ;;  %v580_v18 = vld [vmem:[%s1611_s4] sm:$0xff] }
  0x30   : > { %314 = vperm.xlu1 %1341, %v276_v3   ;;  %286 = vperm.xlu0 %1340, %v264_v4   ;;  %v273_v16 = vld [vmem:[%s1608_s1 + $0x50] sm:$0xff]  ;;  %v583_v19 = vld [vmem:[%s1611_s4 + $0x18] sm:$0xff]  ;;  %v994_v21 = vld [vmem:[%s1611_s4 + $0x28] sm:$0xff] }
  0x31   : > { %v582_v20 = vld [vmem:[%s1611_s4 + $0x10] sm:$0xff]  ;;  %v993_v22 = vld [vmem:[%s1611_s4 + $0x20] sm:$0xff]  ;;  %v996_v23 = vld [vmem:[%s1611_s4 + $0x38] sm:$0xff] }
  0x32   : > { %v995_v24 = vld [vmem:[%s1611_s4 + $0x30] sm:$0xff]  ;;  %v419_v25 = vld [vmem:[#allocation2] sm:$0xff] }
  0x33   : > { %1112 = vmatprep.mubr.f32.mxu0 %v419_v25  ;;  %v262_v31 = vld [vmem:[%s257_s24] sm:$0x7] }
  0x34   : > { %338 = vperm.xlu1 %1341, %v268_v5   ;;  %333 = vperm.xlu0 %1340, %v267_v6   ;;  %v302_v35 = vrot.slane %v262_v31, %v301_v30  ;;  %v354_v38 = vrot.slane %v262_v31, %v353_v34  ;;  %v386_v46 = vrot.slane %v262_v31, %v385_v39 }
  0x38   : > { %296 = vperm.xlu1 %1341, %v266_v7   ;;  %291 = vperm.xlu0 %1340, %v265_v8  }
  0x3c   : > { %370 = vperm.xlu1 %1341, %v272_v9   ;;  %365 = vperm.xlu0 %1340, %v271_v10  }
  0x40   : > { %324 = vperm.xlu1 %1341, %v278_v11   ;;  %319 = vperm.xlu0 %1340, %v277_v12  }
  0x44   : > { %348 = vperm.xlu1 %1341, %v270_v13   ;;  %343 = vperm.xlu0 %1340, %v269_v14  }
  0x48   : > { %380 = vperm.xlu1 %1341, %v274_v15   ;;  %375 = vperm.xlu0 %1340, %v273_v16  }
  0x4c   : > { %591 = vperm.xlu1 %1341, %v581_v17   ;;  %586 = vperm.xlu0 %1340, %v580_v18  }
  0x50   : > { %601 = vperm.xlu1 %1341, %v583_v19   ;;  %596 = vperm.xlu0 %1340, %v582_v20  }
  0x54   : > { %806 = vperm.xlu1 %1341, %v994_v21   ;;  %801 = vperm.xlu0 %1340, %v993_v22  }
  0x58   : > { %816 = vperm.xlu1 %1341, %v996_v23   ;;  %811 = vperm.xlu0 %1340, %v995_v24  }
  0xab   : > { %v310_v28 = vpop.permute.xlu1 %309  ;;  %v282_v29 = vpop.permute.xlu0 %281 }
  0xac   : > { %v303_v40 = vmul.f32 %v302_v35, %v282_v29 }
  0xae   : > { %v327_v47 = vadd.f32 %v310_v28, %v303_v40 }
  0xaf   : > { %v315_v32 = vpop.permute.xlu1 %314  ;;  %v287_v33 = vpop.permute.xlu0 %286 }
  0xb0   : > { %v304_v41 = vmul.f32 %v302_v35, %v287_v33 }
  0xb2   : > { %v328_v48 = vadd.f32 %v315_v32, %v304_v41 }
  0xb3   : > { %v1573_v36 = vpop.permute.xlu1 %338  ;;  %v1575_v37 = vpop.permute.xlu0 %333 }
  0xb4   : > { %v356_v44 = vmul.f32 %v354_v38, %v1573_v36  ;;  %v355_v45 = vmul.f32 %v354_v38, %v1575_v37 }
  0xb6   : > { %v360_v51 = vadd.f32 %v356_v44, %v328_v48  ;;  %v359_v52 = vadd.f32 %v355_v45, %v327_v47  ;;  %v421_v44 = vld [vmem:[#allocation2 + $0x10] sm:$0xff]  ;;  %v422_v45 = vld [vmem:[#allocation2 + $0x18] sm:$0xff]  ;;  %v424_v47 = vld [vmem:[#allocation2 + $0x28] sm:$0xff] }
  0xb7   : > { %v297_v42 = vpop.permute.xlu1 %296  ;;  %v292_v43 = vpop.permute.xlu0 %291  ;;  %v425_v48 = vld [vmem:[#allocation2 + $0x30] sm:$0xff] }
  0xb8   : > { %v306_v61 = vmul.f32 %v302_v35, %v297_v42  ;;  %v305_v62 = vmul.f32 %v302_v35, %v292_v43 }
  0xbb   : > { %v1579_v49 = vpop.permute.xlu1 %370  ;;  %v1581_v50 = vpop.permute.xlu0 %365 }
  0xbc   : > { %v388_v53 = vmul.f32 %v386_v46, %v1579_v49  ;;  %v387_v54 = vmul.f32 %v386_v46, %v1581_v50 }
  0xbe   : > { %v392_v55 = vadd.f32 %v388_v53, %v360_v51  ;;  %v391_v56 = vadd.f32 %v387_v54, %v359_v52  ;;  %v428_v51 = vld [vmem:[#allocation2 + $0x48] sm:$0xff]  ;;  %v429_v52 = vld [vmem:[#allocation2 + $0x50] sm:$0xff]  ;;  %v430_v53 = vld [vmem:[#allocation2 + $0x58] sm:$0xff] }
  0xbf   : > { %v325_v57 = vpop.permute.xlu1 %324  ;;  %v320_v58 = vpop.permute.xlu0 %319  ;;  %v431_v54 = vld [vmem:[#allocation2 + $0x60] sm:$0xff] }
  0xc0   : > { %1342 = vtanh.f32 %v392_v55  ;;  %v330_v1 = vadd.f32 %v325_v57, %v306_v61  ;;  %v329_v2 = vadd.f32 %v320_v58, %v305_v62  ;;  %v432_v55 = vld [vmem:[#allocation2 + $0x68] sm:$0xff]  ;;  %v434_v57 = vld [vmem:[#allocation2 + $0x78] sm:$0xff]  ;;  %v633_v58 = vld [vmem:[#allocation2 + $0x80] sm:$0xff] }
  0xc1   : > { %1344 = vtanh.f32 %v391_v56  ;;  %v433_v56 = vld [vmem:[#allocation2 + $0x70] sm:$0xff]  ;;  %1168 = vmatprep.mubr.f32.mxu1 %v633_v58  ;;  %v641_v58 = vld [vmem:[#allocation2 + $0xc0] sm:$0xff] }
  0xc3   : > { %v349_v59 = vpop.permute.xlu1 %348  ;;  %v344_v60 = vpop.permute.xlu0 %343 }
  0xc4   : > { %v358_v63 = vmul.f32 %v354_v38, %v349_v59  ;;  %v357_v0 = vmul.f32 %v354_v38, %v344_v60 }
  0xc6   : > { %v362_v5 = vadd.f32 %v358_v63, %v330_v1  ;;  %v361_v6 = vadd.f32 %v357_v0, %v329_v2 }
  0xc7   : > { %v381_v3 = vpop.permute.xlu1 %380  ;;  %v376_v4 = vpop.permute.xlu0 %375 }
  0xc8   : > { %v390_v7 = vmul.f32 %v386_v46, %v381_v3  ;;  %v389_v8 = vmul.f32 %v386_v46, %v376_v4  ;;  %v423_v46 = vld [vmem:[#allocation2 + $0x20] sm:$0xff] }
  0xca   : > { %v1343_v9 = vpop.eup %1342  ;;  %v394_v10 = vadd.f32 %v390_v7, %v362_v5  ;;  %v393_v11 = vadd.f32 %v389_v8, %v361_v6 }
  0xcb   : > { %v1345_v12 = vpop.eup %1344  ;;  %v400_v14 = vmul.f32 %v1343_v9, %v1343_v9 }
  0xcc   : > { %1346 = vtanh.f32 %v394_v10  ;;  %v1227_v13 = vpack.c.bf16 %v1343_v9, %v1345_v12  ;;  %v399_v15 = vmul.f32 %v1345_v12, %v1345_v12 }
  0xcd   : > { %1348 = vtanh.f32 %v393_v11  ;;  %v404_v16 = vsub.f32 1.0, %v400_v14 }
  0xce   : > { %1228 = vmatprep.subr.bf16.mxu0 %v1227_v13  ;;  %v403_v17 = vsub.f32 1.0, %v399_v15 }
  0xcf   : > { %1230 = vmatpush3.bf16.msra.mxu0 %v1227_v13  ;;  %v408_v20 = vmul.f32 %v404_v16, %v287_v33  ;;  %v412_v34 = vmul.f32 %v404_v16, %v1573_v36  ;;  %v416_v38 = vmul.f32 %v404_v16, %v1579_v49  ;;  %v426_v49 = vld [vmem:[#allocation2 + $0x38] sm:$0xff] }
  0xd0   : > { %v407_v19 = vmul.f32 %v403_v17, %v282_v29  ;;  %v411_v32 = vmul.f32 %v403_v17, %v1575_v37  ;;  %v415_v39 = vmul.f32 %v403_v17, %v1581_v50  ;;  %v420_v37 = vld [vmem:[#allocation2 + $0x8] sm:$0xff]  ;;  %v427_v50 = vld [vmem:[#allocation2 + $0x40] sm:$0xff] }
  0xd2   : > { %v1235_v27 = vpack.c.bf16 %v408_v20, %v407_v19  ;;  %v1243_v29 = vpack.c.bf16 %v412_v34, %v411_v32  ;;  %v1251_v41 = vpack.c.bf16 %v416_v38, %v415_v39 }
  0xd6   : > { %v1347_v18 = vpop.eup %1346 }
  0xd7   : > { %v1349_v21 = vpop.eup %1348  ;;  %v402_v22 = vmul.f32 %v1347_v18, %v1347_v18 }
  0xd8   : > { %v401_v23 = vmul.f32 %v1349_v21, %v1349_v21  ;;  %v1231_v24 = vpack.c.bf16 %v1347_v18, %v1349_v21 }
  0xd9   : > { %v406_v25 = vsub.f32 1.0, %v402_v22 }
  0xda   : > { %v405_v26 = vsub.f32 1.0, %v401_v23  ;;  %1232 = vmatprep.subr.bf16.mxu0 %v1231_v24 }
  0xdb   : > { %1234 = vmatpush3.bf16.msra.mxu0 %v1231_v24  ;;  %v410_v28 = vmul.f32 %v406_v25, %v297_v42  ;;  %v414_v35 = vmul.f32 %v406_v25, %v349_v59  ;;  %v418_v42 = vmul.f32 %v406_v25, %v381_v3  ;;  %v592_v59 = vpop.permute.xlu1 %591 }
  0xdc   : > { %1236 = vmatprep.subr.bf16.mxu0 %v1235_v27  ;;  %v409_v30 = vmul.f32 %v405_v26, %v292_v43  ;;  %v413_v33 = vmul.f32 %v405_v26, %v344_v60  ;;  %v417_v43 = vmul.f32 %v405_v26, %v376_v4  ;;  %v587_v60 = vpop.permute.xlu0 %586 }
  0xde   : > { %v1239_v31 = vpack.c.bf16 %v410_v28, %v409_v30  ;;  %v1247_v40 = vpack.c.bf16 %v414_v35, %v413_v33  ;;  %v1255_v36 = vpack.c.bf16 %v418_v42, %v417_v43 }
  0xdf   : > { %1238 = vmatpush3.bf16.msra.mxu0 %v1235_v27  ;;  %v602_v1 = vpop.permute.xlu1 %601 }
  0xe0   : > { %1240 = vmatprep.subr.bf16.mxu0 %v1239_v31  ;;  %v597_v3 = vpop.permute.xlu0 %596 }
  0xe3   : > { %1242 = vmatpush3.bf16.msra.mxu0 %v1239_v31 }
  0xe4   : > { %1244 = vmatprep.subr.bf16.mxu0 %v1243_v29 }
  0xe7   : > { %1246 = vmatpush3.bf16.msra.mxu0 %v1243_v29 }
  0xe8   : > { %1248 = vmatprep.subr.bf16.mxu0 %v1247_v40 }
  0xeb   : > { %1250 = vmatpush3.bf16.msra.mxu0 %v1247_v40 }
  0xec   : > { %1252 = vmatprep.subr.bf16.mxu0 %v1251_v41 }
  0xef   : > { %1254 = vmatpush3.bf16.msra.mxu0 %v1251_v41 }
  0xf0   : > { %1256 = vmatprep.subr.bf16.mxu0 %v1255_v36 }
  0xf3   : > { %1258 = vmatpush3.bf16.msra.mxu0 %v1255_v36 }
  0xf6   : > { %1113 = vmatmul.mubr.f32.vlgmr.msra.gmra.mrb[0].mxu0 %v420_v37 }
  0xf7   : > { %1115 = vmatprep.mubr.f32.mxu0 %v421_v44 }
  0xfa   : > { %1116 = vmatmul.mubr.f32.gmra.mrb[2].mxu0 %v422_v45 }
  0xfb   : > { %1118 = vmatprep.mubr.f32.mxu0 %v423_v46 }
  0xfe   : > { %1119 = vmatmul.mubr.f32.gmra.mrb[4].mxu0 %v424_v47 }
  0xff   : > { %1121 = vmatprep.mubr.f32.mxu0 %v425_v48 }
 0x102   : > { %1122 = vmatmul.mubr.f32.gmra.mrb[6].mxu0 %v426_v49 }
 0x103   : > { %1124 = vmatprep.mubr.f32.mxu0 %v427_v50 }
 0x106   : > { %1125 = vmatmul.mubr.f32.gmra.mrb[8].mxu0 %v428_v51  ;;  %v634_v51 = vld [vmem:[#allocation2 + $0x88] sm:$0xff] }
 0x107   : > { %1127 = vmatprep.mubr.f32.mxu0 %v429_v52  ;;  %v635_v52 = vld [vmem:[#allocation2 + $0x90] sm:$0xff] }
 0x10a   : > { %1128 = vmatmul.mubr.f32.gmra.mrb[10].mxu0 %v430_v53  ;;  %v636_v53 = vld [vmem:[#allocation2 + $0x98] sm:$0xff] }
 0x10b   : > { %1130 = vmatprep.mubr.f32.mxu0 %v431_v54  ;;  %v637_v54 = vld [vmem:[#allocation2 + $0xa0] sm:$0xff] }
 0x10e   : > { %1131 = vmatmul.mubr.f32.gmra.mrb[12].mxu0 %v432_v55  ;;  %v638_v55 = vld [vmem:[#allocation2 + $0xa8] sm:$0xff] }
 0x10f   : > { %1133 = vmatprep.mubr.f32.mxu0 %v433_v56  ;;  %v639_v56 = vld [vmem:[#allocation2 + $0xb0] sm:$0xff] }
 0x112   : > { %1134 = vmatmul.mubr.f32.gmra.mrb[14].mxu0 %v434_v57  ;;  %v640_v57 = vld [vmem:[#allocation2 + $0xb8] sm:$0xff] }
 0x1c9   : > { %v1114_v61 = vpop.f32.mrb[0].mxu0 }
 0x1ca   : > { %v605_v62 = vadd.f32 %v1114_v61, %v592_v59  ;;  %v501_v63 = vpop.f32.mrb[1].mxu0  ;;  %v642_v59 = vld [vmem:[#allocation2 + $0xc8] sm:$0xff]  ;;  %v644_v61 = vld [vmem:[#allocation2 + $0xd8] sm:$0xff] }
 0x1cb   : > { %v604_v0 = vadd.f32 %v587_v60, %v501_v63  ;;  %v643_v60 = vld [vmem:[#allocation2 + $0xd0] sm:$0xff]  ;;  %v646_v63 = vld [vmem:[#allocation2 + $0xe8] sm:$0xff] }
 0x1cc   : > { %1350 = vtanh.f32 %v605_v62  ;;  %v645_v62 = vld [vmem:[#allocation2 + $0xe0] sm:$0xff] }
 0x1cd   : > { %1352 = vtanh.f32 %v604_v0  ;;  %v1117_v2 = vpop.f32.mrb[2].mxu0  ;;  %v647_v0 = vld [vmem:[#allocation2 + $0xf0] sm:$0xff] }
 0x1ce   : > { %v607_v4 = vadd.f32 %v1117_v2, %v602_v1  ;;  %v511_v5 = vpop.f32.mrb[3].mxu0  ;;  %v648_v1 = vld [vmem:[#allocation2 + $0xf8] sm:$0xff]  ;;  %v1410_v2 = vmov 0.0|0.0  }
 0x1cf   : > { %v606_v6 = vadd.f32 %v597_v3, %v511_v5  ;;  %1291 = vmatprep.subr.bf16.mxu0 %v1410_v2  ;;  %v1412_v3 = vmov 0.0   ;;  %v802_v5 = vpop.permute.xlu0 %801 }
 0x1d0   : > { %1354 = vtanh.f32 %v607_v4  ;;  %1224 = vmatprep.mubr.msk.f32.mxu0 %vm1411_vm0, %v1412_v3  ;;  %v807_v4 = vpop.permute.xlu1 %806 }
 0x1d1   : > { %1356 = vtanh.f32 %v606_v6  ;;  %v1120_v7 = vpop.f32.mrb[4].mxu0 }
 0x1d2   : > { %v521_v8 = vpop.f32.mrb[5].mxu0 }
 0x1d5   : > { %v1123_v9 = vpop.f32.mrb[6].mxu0 }
 0x1d6   : > { %v1351_v10 = vpop.eup %1350  ;;  %v531_v11 = vpop.f32.mrb[7].mxu0 }
 0x1d7   : > { %v1353_v12 = vpop.eup %1352  ;;  %v613_v13 = vmul.f32 %v1351_v10, %v1351_v10 }
 0x1d8   : > { %v612_v14 = vmul.f32 %v1353_v12, %v1353_v12  ;;  %v1259_v15 = vpack.c.bf16 %v1351_v10, %v1353_v12  ;;  %v817_v10 = vpop.permute.xlu1 %816  ;;  %v812_v12 = vpop.permute.xlu0 %811 }
 0x1d9   : > { %v617_v16 = vsub.f32 1.0, %v613_v13  ;;  %v1126_v17 = vpop.f32.mrb[8].mxu0 }
 0x1da   : > { %v1355_v18 = vpop.eup %1354  ;;  %v616_v19 = vsub.f32 1.0, %v612_v14  ;;  %1260 = vmatprep.subr.bf16.mxu1 %v1259_v15  ;;  %v541_v20 = vpop.f32.mrb[9].mxu0 }
 0x1db   : > { %v1357_v21 = vpop.eup %1356  ;;  %v621_v22 = vmul.f32 %v1120_v7, %v617_v16  ;;  %v615_v23 = vmul.f32 %v1355_v18, %v1355_v18  ;;  %v625_v24 = vmul.f32 %v1126_v17, %v617_v16  ;;  %1262 = vmatpush3.bf16.msra.mxu1 %v1259_v15 }
 0x1dc   : > { %v620_v25 = vmul.f32 %v616_v19, %v521_v8  ;;  %v614_v26 = vmul.f32 %v1357_v21, %v1357_v21  ;;  %v624_v27 = vmul.f32 %v616_v19, %v541_v20  ;;  %v1263_v28 = vpack.c.bf16 %v1355_v18, %v1357_v21 }
 0x1dd   : > { %v619_v30 = vsub.f32 1.0, %v615_v23  ;;  %v1129_v31 = vpop.f32.mrb[10].mxu0 }
 0x1de   : > { %v1267_v32 = vpack.c.bf16 %v621_v22, %v620_v25  ;;  %v618_v34 = vsub.f32 1.0, %v614_v26  ;;  %v1275_v29 = vpack.c.bf16 %v625_v24, %v624_v27  ;;  %1264 = vmatprep.subr.bf16.mxu1 %v1263_v28  ;;  %v551_v33 = vpop.f32.mrb[11].mxu0 }
 0x1df   : > { %v623_v35 = vmul.f32 %v1123_v9, %v619_v30  ;;  %v627_v38 = vmul.f32 %v1129_v31, %v619_v30  ;;  %1266 = vmatpush3.bf16.msra.mxu1 %v1263_v28 }
 0x1e0   : > { %v622_v39 = vmul.f32 %v618_v34, %v531_v11  ;;  %v626_v40 = vmul.f32 %v618_v34, %v551_v33  ;;  %1268 = vmatprep.subr.bf16.mxu1 %v1267_v32 }
 0x1e1   : > { %v1132_v41 = vpop.f32.mrb[12].mxu0 }
 0x1e2   : > { %v1271_v42 = vpack.c.bf16 %v623_v35, %v622_v39  ;;  %v1279_v43 = vpack.c.bf16 %v627_v38, %v626_v40  ;;  %v629_v36 = vmul.f32 %v1132_v41, %v617_v16  ;;  %v561_v37 = vpop.f32.mrb[13].mxu0 }
 0x1e3   : > { %v628_v44 = vmul.f32 %v616_v19, %v561_v37  ;;  %1270 = vmatpush3.bf16.msra.mxu1 %v1267_v32 }
 0x1e4   : > { %1272 = vmatprep.subr.bf16.mxu1 %v1271_v42 }
 0x1e5   : > { %v1283_v45 = vpack.c.bf16 %v629_v36, %v628_v44  ;;  %v1135_v46 = vpop.f32.mrb[14].mxu0 }
 0x1e6   : > { %v631_v47 = vmul.f32 %v1135_v46, %v619_v30  ;;  %v571_v48 = vpop.f32.mrb[15].mxu0 }
 0x1e7   : > { %v630_v49 = vmul.f32 %v618_v34, %v571_v48  ;;  %1274 = vmatpush3.bf16.msra.mxu1 %v1271_v42 }
 0x1e8   : > { %1276 = vmatprep.subr.bf16.mxu1 %v1275_v29 }
 0x1e9   : > { %v1287_v50 = vpack.c.bf16 %v631_v47, %v630_v49 }
 0x1eb   : > { %1278 = vmatpush3.bf16.msra.mxu1 %v1275_v29 }
 0x1ec   : > { %1280 = vmatprep.subr.bf16.mxu1 %v1279_v43 }
 0x1ef   : > { %1282 = vmatpush3.bf16.msra.mxu1 %v1279_v43 }
 0x1f0   : > { %1284 = vmatprep.subr.bf16.mxu1 %v1283_v45 }
 0x1f3   : > { %1286 = vmatpush3.bf16.msra.mxu1 %v1283_v45 }
 0x1f4   : > { %1288 = vmatprep.subr.bf16.mxu1 %v1287_v50 }
 0x1f7   : > { %1290 = vmatpush3.bf16.msra.mxu1 %v1287_v50 }
 0x1fa   : > { %1169 = vmatmul.mubr.f32.vlgmr.msra.gmra.mrb[0].mxu1 %v634_v51 }
 0x1fb   : > { %1171 = vmatprep.mubr.f32.mxu1 %v635_v52 }
 0x1fe   : > { %1172 = vmatmul.mubr.f32.gmra.mrb[2].mxu1 %v636_v53 }
 0x1ff   : > { %1174 = vmatprep.mubr.f32.mxu1 %v637_v54 }
 0x202   : > { %1175 = vmatmul.mubr.f32.gmra.mrb[4].mxu1 %v638_v55 }
 0x203   : > { %1177 = vmatprep.mubr.f32.mxu1 %v639_v56 }
 0x206   : > { %1178 = vmatmul.mubr.f32.gmra.mrb[6].mxu1 %v640_v57 }
 0x207   : > { %1180 = vmatprep.mubr.f32.mxu1 %v641_v58 }
 0x20a   : > { %1181 = vmatmul.mubr.f32.gmra.mrb[8].mxu1 %v642_v59 }
 0x20b   : > { %1183 = vmatprep.mubr.f32.mxu1 %v643_v60  ;;  %v847_v60 = vld [vmem:[%s1612_s5] sm:$0xff] }
 0x20e   : > { %1184 = vmatmul.mubr.f32.gmra.mrb[10].mxu1 %v644_v61 }
 0x20f   : > { %1186 = vmatprep.mubr.f32.mxu1 %v645_v62 }
 0x212   : > { %1187 = vmatmul.mubr.f32.gmra.mrb[12].mxu1 %v646_v63 }
 0x213   : > { %1189 = vmatprep.mubr.f32.mxu1 %v647_v0 }
 0x216   : > { %1190 = vmatmul.mubr.f32.gmra.mrb[14].mxu1 %v648_v1 }
 0x2cd   : > { %v1170_v6 = vpop.f32.mrb[0].mxu1 }
 0x2ce   : > { %v820_v7 = vadd.f32 %v1170_v6, %v807_v4  ;;  %v715_v8 = vpop.f32.mrb[1].mxu1 }
 0x2cf   : > { %v819_v9 = vadd.f32 %v802_v5, %v715_v8 }
 0x2d0   : > { %1358 = vtanh.f32 %v820_v7 }
 0x2d1   : > { %1360 = vtanh.f32 %v819_v9  ;;  %v1173_v11 = vpop.f32.mrb[2].mxu1 }
 0x2d2   : > { %v822_v13 = vadd.f32 %v1173_v11, %v817_v10  ;;  %v725_v14 = vpop.f32.mrb[3].mxu1 }
 0x2d3   : > { %v821_v15 = vadd.f32 %v812_v12, %v725_v14 }
 0x2d4   : > { %1362 = vtanh.f32 %v822_v13 }
 0x2d5   : > { %1364 = vtanh.f32 %v821_v15  ;;  %v1176_v16 = vpop.f32.mrb[4].mxu1 }
 0x2d6   : > { %v735_v17 = vpop.f32.mrb[5].mxu1 }
 0x2d9   : > { %v1179_v18 = vpop.f32.mrb[6].mxu1 }
 0x2da   : > { %v1359_v19 = vpop.eup %1358  ;;  %v745_v20 = vpop.f32.mrb[7].mxu1 }
 0x2db   : > { %v1361_v21 = vpop.eup %1360  ;;  %v828_v22 = vmul.f32 %v1359_v19, %v1359_v19 }
 0x2dc   : > { %v827_v23 = vmul.f32 %v1361_v21, %v1361_v21  ;;  %v1292_v24 = vpack.c.bf16 %v1359_v19, %v1361_v21 }
 0x2dd   : > { %v832_v25 = vsub.f32 1.0, %v828_v22  ;;  %v1182_v26 = vpop.f32.mrb[8].mxu1 }
 0x2de   : > { %v1363_v27 = vpop.eup %1362  ;;  %v831_v28 = vsub.f32 1.0, %v827_v23  ;;  %1293 = vmatpush3.bf16.msra.mxu0 %v1292_v24  ;;  %v755_v30 = vpop.f32.mrb[9].mxu1 }
 0x2df   : > { %v1365_v31 = vpop.eup %1364  ;;  %v836_v32 = vmul.f32 %v1176_v16, %v832_v25  ;;  %v830_v34 = vmul.f32 %v1363_v27, %v1363_v27  ;;  %v840_v29 = vmul.f32 %v1182_v26, %v832_v25  ;;  %1294 = vmatprep.subr.bf16.mxu0 %v1410_v2 }
 0x2e0   : > { %v835_v33 = vmul.f32 %v831_v28, %v735_v17  ;;  %v829_v35 = vmul.f32 %v1365_v31, %v1365_v31  ;;  %v839_v38 = vmul.f32 %v831_v28, %v755_v30  ;;  %v1295_v39 = vpack.c.bf16 %v1363_v27, %v1365_v31 }
 0x2e1   : > { %v834_v40 = vsub.f32 1.0, %v830_v34  ;;  %v1185_v41 = vpop.f32.mrb[10].mxu1 }
 0x2e2   : > { %v1298_v42 = vpack.c.bf16 %v836_v32, %v835_v33  ;;  %v833_v43 = vsub.f32 1.0, %v829_v35  ;;  %v1304_v36 = vpack.c.bf16 %v840_v29, %v839_v38  ;;  %1296 = vmatpush3.bf16.msra.mxu0 %v1295_v39  ;;  %v765_v37 = vpop.f32.mrb[11].mxu1 }
 0x2e3   : > { %v838_v44 = vmul.f32 %v1179_v18, %v834_v40  ;;  %v842_v45 = vmul.f32 %v1185_v41, %v834_v40  ;;  %1297 = vmatprep.subr.bf16.mxu0 %v1410_v2 }
 0x2e4   : > { %v837_v46 = vmul.f32 %v833_v43, %v745_v20  ;;  %v841_v47 = vmul.f32 %v833_v43, %v765_v37 }
 0x2e5   : > { %v1188_v48 = vpop.f32.mrb[12].mxu1 }
 0x2e6   : > { %v1301_v49 = vpack.c.bf16 %v838_v44, %v837_v46  ;;  %v1307_v50 = vpack.c.bf16 %v842_v45, %v841_v47  ;;  %v844_v51 = vmul.f32 %v1188_v48, %v832_v25  ;;  %v775_v52 = vpop.f32.mrb[13].mxu1  ;;  %1299 = vmatpush3.bf16.msra.mxu0 %v1298_v42 }
 0x2e7   : > { %v843_v53 = vmul.f32 %v831_v28, %v775_v52  ;;  %1300 = vmatprep.subr.bf16.mxu0 %v1410_v2 }
 0x2e9   : > { %v1310_v54 = vpack.c.bf16 %v844_v51, %v843_v53  ;;  %v1191_v55 = vpop.f32.mrb[14].mxu1 }
 0x2ea   : > { %v846_v56 = vmul.f32 %v1191_v55, %v834_v40  ;;  %v785_v57 = vpop.f32.mrb[15].mxu1  ;;  %1302 = vmatpush3.bf16.msra.mxu0 %v1301_v49 }
 0x2eb   : > { %v845_v58 = vmul.f32 %v833_v43, %v785_v57  ;;  %1303 = vmatprep.subr.bf16.mxu0 %v1410_v2 }
 0x2ed   : > { %v1313_v59 = vpack.c.bf16 %v846_v56, %v845_v58 }
 0x2ee   : > { %1305 = vmatpush3.bf16.msra.mxu0 %v1304_v36 }
 0x2ef   : > { %1306 = vmatprep.subr.bf16.mxu0 %v1410_v2 }
 0x2f2   : > { %1308 = vmatpush3.bf16.msra.mxu0 %v1307_v50 }
 0x2f3   : > { %1309 = vmatprep.subr.bf16.mxu0 %v1410_v2 }
 0x2f6   : > { %1311 = vmatpush3.bf16.msra.mxu0 %v1310_v54 }
 0x2f7   : > { %1312 = vmatprep.subr.bf16.mxu0 %v1410_v2 }
 0x2fa   : > { %1314 = vmatpush3.bf16.msra.mxu0 %v1313_v59 }
 0x2fd   : > { %1225 = vmatmul.mubr.f32.vlgmr.msra.gmra.mrb[16].mxu0 %v847_v60 }
 0x3d0   : > { %v914_v61 = vpop.f32.mrb[16].mxu0 }
 0x3d1   : > { %918 = vst [vmem:[%s261_s30] sm:$0xff] %v914_v61  ;;  %v1226_v62 = vpop.f32.mrb[17].mxu0 }
 0x3d2 PF: > { %s17_s21 = sadd.s32 1, %s1404_s21  }
 0x3d3   : > { %p14_p3 = scmp.ge.s32.totalorder %s17_s21, 4  }
 0x3d5   :  { %16 = sbr.rel (!%p14_p3) target bundleno = 1 (0x1), region = 81 }
 0x3dc   :  { %938 = vsyncpa [#allocation3], 1 }
 0x3dd   :  { %940 = vsyncpa [#allocation3 + $0x1], 1 }

</bundles_post_ra>
